<compile_context>
chip_gen: v5e
topology: v5e:2x2
jax: 0.10.0
libtpu: 0.0.40
codegen_flags: <defaults>
</compile_context>

<pallas_src>
import functools

import jax
import jax.numpy as jnp
from jax.experimental import pallas as pl
from jax.experimental.pallas import tpu as pltpu


# --------------------------------------------------------------------------
# Hot kernel: per (batch, HW-tile) gating.  Layout inside the kernel:
#   x_ref     : (1, C, T)   input tile, NCHW layout (C = sublanes, T = lanes)
#   cgate_ref : (1, C, 1)   precomputed channel gate for this batch element
#   ws_ref    : (C, 1)      sSE 1x1-conv weights
#   bs_ref    : (1,)        sSE bias (SMEM scalar)
#   o_ref     : (1, C, T)
# --------------------------------------------------------------------------
def _scse_gate_kernel(x_ref, cgate_ref, ws_ref, bs_ref, o_ref):
    x = x_ref[0].astype(jnp.float32)            # (C, T), compute in f32
    cgate = cgate_ref[0]                         # (C, 1) f32
    ws = ws_ref[...]                             # (C, 1) f32
    bs = bs_ref[0]                               # scalar f32 (SMEM)

    # sSE: per-pixel 1x1 conv over channels -> VPU multiply + sublane reduce.
    sgate = jax.nn.sigmoid(
        jnp.sum(x * ws, axis=0, keepdims=True) + bs)          # (1, T)

    # Fused gating: x * (cSE + sSE)  -- single multiply per element.
    gate = cgate + sgate                                       # (C, T) bcast add
    o_ref[0] = (x * gate).astype(o_ref.dtype)


# --------------------------------------------------------------------------
# cSE branch (tiny: N*C work) -- plain JAX, always in f32.
# --------------------------------------------------------------------------
def _cse_gate(x_ncs, w1, b1, w2, b2):
    s = jnp.mean(x_ncs.astype(jnp.float32), axis=2)            # (N, C)
    z1 = jnp.maximum(s @ w1.astype(jnp.float32) + b1.astype(jnp.float32), 0.0)
    return jax.nn.sigmoid(z1 @ w2.astype(jnp.float32) + b2.astype(jnp.float32))


def _pick_hw_tile(hw, c, itemsize, budget_bytes=4 << 20):
    """Largest multiple-of-128 divisor of hw whose double-buffered in+out
    footprint (~4 * c * t * itemsize) fits the budget; falls back to full hw
    (a full-extent block is always a legal block shape)."""
    max_t = budget_bytes // (4 * c * itemsize)
    if hw <= 128 or hw % 128 != 0 or max_t < 128:
        return hw
    t = (min(hw, max_t) // 128) * 128
    while t >= 128 and hw % t != 0:
        t -= 128
    return t if t >= 128 else hw


@functools.partial(jax.jit, static_argnames=())
def scse_pallas(x_nchw, w1, b1, w2, b2, ws, bs):
    """SCSE forward.

    x_nchw : (N, C, H, W), f32 or bf16 (bf16 halves HBM traffic; gates f32).
    w1     : (C, C//r)   cSE conv1 weights, (in, out) layout
    b1     : (1, C//r)
    w2     : (C//r, C)   cSE conv2 weights
    b2     : (1, C)
    ws     : (C, 1)      sSE conv weights
    bs     : (1, 1)      sSE bias
    """
    N, C, H, W = x_nchw.shape
    HW = H * W

    # Free reshape: stays contiguous in NCHW order, no transpose through HBM.
    x = x_nchw.reshape(N, C, HW)

    # Phase 1 (tiny): channel gate, computed once per (n, c) in plain JAX.
    cgate = _cse_gate(x, w1, b1, w2, b2).reshape(N, C, 1)       # (N, C, 1) f32

    ws_col = ws.reshape(C, 1).astype(jnp.float32)
    bs_vec = bs.reshape(1).astype(jnp.float32)

    T = _pick_hw_tile(HW, C, jnp.dtype(x.dtype).itemsize)
    grid = (N, HW // T)

    out = pl.pallas_call(
        _scse_gate_kernel,
        out_shape=jax.ShapeDtypeStruct((N, C, HW), x.dtype),
        grid=grid,
        in_specs=[
            pl.BlockSpec((1, C, T), lambda n, t: (n, 0, t)),      # x tile
            pl.BlockSpec((1, C, 1), lambda n, t: (n, 0, 0)),      # cgate (VMEM-resident)
            pl.BlockSpec((C, 1), lambda n, t: (0, 0)),            # ws    (VMEM-resident)
            pl.BlockSpec(memory_space=pltpu.MemorySpace.SMEM),    # bs scalar -> SMEM
        ],
        out_specs=pl.BlockSpec((1, C, T), lambda n, t: (n, 0, t)),
        compiler_params=pltpu.CompilerParams(
            # Both axes independent (cgate precomputed) -> shardable across the
            # 2 TensorCores on v7x; plain sequential loop on v5e/v6e.
            dimension_semantics=("parallel", "parallel"),
        ),
    )(x, cgate, ws_col, bs_vec)

    return out.reshape(N, C, H, W)


# --------------------------------------------------------------------------
# Pure-JAX reference of the PyTorch forward, for validation.
# --------------------------------------------------------------------------
def scse_reference(x_nchw, w1, b1, w2, b2, ws, bs):
    s = jnp.mean(x_nchw, axis=(2, 3))                            # (N, C)
    z1 = jnp.maximum(s @ w1 + b1, 0.0)                           # (N, Cmid)
    cgate = jax.nn.sigmoid(z1 @ w2 + b2)[:, :, None, None]       # (N, C, 1, 1)
    sgate = jax.nn.sigmoid(
        jnp.einsum("nchw,co->nohw", x_nchw, ws) + bs.reshape(1, 1, 1, 1))
    return x_nchw * cgate + x_nchw * sgate


if __name__ == "__main__":
    # Small shapes consistent with the module (reduction=16 needs C >= 16).
    N, C, H, W = 2, 32, 16, 16
    reduction = 16
    Cmid = C // reduction                                        # 2

    key = jax.random.PRNGKey(0)
    kx, k1, kb1, k2, kb2, ks, kbs = jax.random.split(key, 7)

    x = jax.random.normal(kx, (N, C, H, W), dtype=jnp.float32)

    # Conv2d 1x1 == linear over channels; weights stored as (in, out).
    w1 = jax.random.normal(k1, (C, Cmid), dtype=jnp.float32) * 0.1
    b1 = jax.random.normal(kb1, (1, Cmid), dtype=jnp.float32) * 0.1
    w2 = jax.random.normal(k2, (Cmid, C), dtype=jnp.float32) * 0.1
    b2 = jax.random.normal(kb2, (1, C), dtype=jnp.float32) * 0.1
    ws = jax.random.normal(ks, (C, 1), dtype=jnp.float32) * 0.1
    bs = jax.random.normal(kbs, (1, 1), dtype=jnp.float32) * 0.1

    # f32 path: exact check against the reference.
    out = jax.block_until_ready(scse_pallas(x, w1, b1, w2, b2, ws, bs))
    ref = scse_reference(x, w1, b1, w2, b2, ws, bs)
    assert out.shape == (N, C, H, W)
    assert jnp.allclose(out, ref, atol=1e-5, rtol=1e-5), "f32 mismatch vs reference"

    # bf16 streaming path (halves HBM traffic; gate math stays f32 in-kernel).
    out_bf16 = jax.block_until_ready(
        scse_pallas(x.astype(jnp.bfloat16), w1, b1, w2, b2, ws, bs))
    assert out_bf16.dtype == jnp.bfloat16
    assert jnp.allclose(out_bf16.astype(jnp.float32), ref, atol=5e-2, rtol=5e-2), \
        "bf16 mismatch vs reference"

    print("KERNEL_OK")
</pallas_src>

<mosaic_0001>
module attributes {stable_mosaic.version = 11 : i64} {
  func.func @_scse_gate_kernel(%arg0: i32, %arg1: i32, %arg2: memref<1x32x256xf32, #tpu.memory_space<vmem>>, %arg3: memref<1x32x1xf32, #tpu.memory_space<vmem>>, %arg4: memref<32x1xf32, #tpu.memory_space<vmem>>, %arg5: memref<1xf32, #tpu.memory_space<smem>>, %arg6: memref<1x32x256xf32, #tpu.memory_space<vmem>>) attributes {dimension_semantics = [#tpu.dimension_semantics<parallel>, #tpu.dimension_semantics<parallel>], iteration_bounds = array<i64: 2, 1>, scalar_prefetch = 0 : i64, scratch_operands = 0 : i64, tpu.core_type = #tpu.core_type<tc>, window_params = [{transform_indices = @transform_0, window_bounds = array<i64: 1, 32, 256>}, {transform_indices = @transform_1, window_bounds = array<i64: 1, 32, 1>}, {pipeline_mode = #tpu.pipeline_mode<synchronous>, transform_indices = @transform_2, window_bounds = array<i64: 32, 1>}, {transform_indices = @transform_3, window_bounds = array<i64: 1>}, {transform_indices = @transform_4, window_bounds = array<i64: 1, 32, 256>}]} {
    %c0 = arith.constant 0 : index
    %c0_0 = arith.constant 0 : index
    %c0_1 = arith.constant 0 : index
    %0 = vector.load %arg2[%c0, %c0_0, %c0_1] : memref<1x32x256xf32, #tpu.memory_space<vmem>>, vector<1x32x256xf32>
    %1 = vector.shape_cast %0 : vector<1x32x256xf32> to vector<32x256xf32>
    %c0_2 = arith.constant 0 : index
    %c0_3 = arith.constant 0 : index
    %c0_4 = arith.constant 0 : index
    %2 = vector.load %arg3[%c0_2, %c0_3, %c0_4] : memref<1x32x1xf32, #tpu.memory_space<vmem>>, vector<1x32x1xf32>
    %3 = vector.shape_cast %2 : vector<1x32x1xf32> to vector<32x1xf32>
    %c0_5 = arith.constant 0 : index
    %c0_6 = arith.constant 0 : index
    %4 = vector.load %arg4[%c0_5, %c0_6] : memref<32x1xf32, #tpu.memory_space<vmem>>, vector<32x1xf32>
    %c0_7 = arith.constant 0 : index
    %5 = memref.load %arg5[%c0_7] : memref<1xf32, #tpu.memory_space<smem>>
    %6 = vector.broadcast %4 : vector<32x1xf32> to vector<32x256xf32>
    %7 = arith.mulf %1, %6 : vector<32x256xf32>
    %cst = arith.constant dense<0.000000e+00> : vector<256xf32>
    %8 = vector.multi_reduction <add>, %7, %cst [0] : vector<32x256xf32> to vector<256xf32>
    %9 = vector.shape_cast %8 : vector<256xf32> to vector<1x256xf32>
    %10 = vector.broadcast %5 : f32 to vector<1x256xf32>
    %11 = arith.addf %9, %10 : vector<1x256xf32>
    %12 = arith.negf %11 : vector<1x256xf32>
    %13 = math.exp %12 : vector<1x256xf32>
    %cst_8 = arith.constant 1.000000e+00 : f32
    %14 = vector.broadcast %cst_8 : f32 to vector<1x256xf32>
    %15 = arith.addf %14, %13 : vector<1x256xf32>
    %16 = arith.divf %14, %15 : vector<1x256xf32>
    %17 = vector.broadcast %3 : vector<32x1xf32> to vector<32x256xf32>
    %18 = vector.broadcast %16 : vector<1x256xf32> to vector<32x256xf32>
    %19 = arith.addf %17, %18 : vector<32x256xf32>
    %20 = arith.mulf %1, %19 : vector<32x256xf32>
    %c0_9 = arith.constant 0 : index
    %c0_10 = arith.constant 0 : index
    %c0_11 = arith.constant 0 : index
    %21 = vector.load %arg6[%c0_9, %c0_10, %c0_11] : memref<1x32x256xf32, #tpu.memory_space<vmem>>, vector<1x32x256xf32>
    %22 = vector.shape_cast %21 : vector<1x32x256xf32> to vector<32x256xf32>
    %23 = vector.shape_cast %20 : vector<32x256xf32> to vector<1x32x256xf32>
    tpu.vector_store %arg6[%c0_9, %c0_10, %c0_11], %23 {strides = array<i32>} : memref<1x32x256xf32, #tpu.memory_space<vmem>>, vector<1x32x256xf32>,
    return
  }
  func.func @transform_0(%arg0: i32, %arg1: i32) -> (i32, i32, i32) {
    %c0_i32 = arith.constant 0 : i32
    %c0_i32_0 = arith.constant 0 : i32
    return %arg0, %c0_i32, %arg1 : i32, i32, i32
  }
  func.func @transform_1(%arg0: i32, %arg1: i32) -> (i32, i32, i32) {
    %c0_i32 = arith.constant 0 : i32
    %c0_i32_0 = arith.constant 0 : i32
    %c0_i32_1 = arith.constant 0 : i32
    return %arg0, %c0_i32, %c0_i32_0 : i32, i32, i32
  }
  func.func @transform_2(%arg0: i32, %arg1: i32) -> (i32, i32) {
    %c0_i32 = arith.constant 0 : i32
    %c0_i32_0 = arith.constant 0 : i32
    %c0_i32_1 = arith.constant 0 : i32
    return %c0_i32, %c0_i32_0 : i32, i32
  }
  func.func @transform_3(%arg0: i32, %arg1: i32) -> i32 {
    %c0_i32 = arith.constant 0 : i32
    %c0_i32_0 = arith.constant 0 : i32
    return %c0_i32 : i32
  }
  func.func @transform_4(%arg0: i32, %arg1: i32) -> (i32, i32, i32) {
    %c0_i32 = arith.constant 0 : i32
    %c0_i32_0 = arith.constant 0 : i32
    return %arg0, %c0_i32, %arg1 : i32, i32, i32
  }
}

</mosaic_0001>

<bundles_post_ra>
// kernel: scse_pallas.1
= control target key start
LH: loop header
LB: loop body
LE: loop exit
PB: predicated region body
PF: predicated region fallthrough
CT: control target
= control target key end

     0   :  { %s612_s17 = smov 0   ;;  %s614_s18 = smov 0   ;;  %s700_s0 = inlined_call_operand.vmem [shape: f32[2,32,256], index: 0, kind: input, shape index: {}]   ;;  %s701_s1 = inlined_call_operand.vmem [shape: f32[2,32,1], index: 1, kind: input, shape index: {}]   ;;  %s702_s2 = inlined_call_operand.vmem [shape: f32[32,1], index: 2, kind: input, shape index: {}]   ;;  %s703_s3 = inlined_call_operand.<no memory space> [shape: f32[1], index: 3, kind: input, shape index: {}]   ;;  %s704_s4 = inlined_call_operand.vmem [shape: f32[2,32,256], index: 4, kind: output, shape index: {}]  }
   0x1   :  { %9 = sst [smem:[#allocation2]] %s703_s3  ;;  %s616_s19 = smov 0  }
   0x2 LB: > { %s27_s3 = sadd.s32 1, %s577_s18  ;;  %p509_p0 = scmp.ge.s32.totalorder %s581_s19, 1  ;;  %s581_s19 = sphi %s616_s19, %s15_s19   ;;  %s577_s18 = sphi %s614_s18, %s706_s18   ;;  %s573_s17 = sphi %s612_s17, %s705_s17  }
   0x3   : > { %p29_p1 = scmp.ge.s32.totalorder %s27_s3, 2  ;;  %p194_p2 = scmp.lt.s32.totalorder %s581_s19, 3 }
   0x5   : > { %s708_s3 = smov (%p29_p1, %s27_s3), 0  ;;  %p195_p3 = pnand %p509_p0, %p194_p2 }
   0x6   : > { %p234_p4 = scmp.lt.s32.totalorder (!%p195_p3), %s573_s17, 1  ;;  %s274_s10 = sld [smem:[#allocation2]] (!%p195_p3) }
   0x7   : > { %198 = sbr.rel (%p195_p3) target bundleno = 199 (0xc7), region = 36 }
   0xc   : > { %v272_v0 = vld [vmem:[%s702_s2 + $0x10] sm:$0xff]  ;;  %v270_v1 = vld [vmem:[%s702_s2] sm:$0xff]  ;;  %v583_v2 = vmov 0   ;;  %s710_s17 = smov (!%p234_p4, %s573_s17), 1  ;;  %v273_v4 = vld [vmem:[%s702_s2 + $0x18] sm:$0xff]  ;;  %v321_v45 = vstv %s274_s10 }
   0xd   : > { %549 = vset.pattern.permute.xlu1 %v583_v2  ;;  %548 = vset.pattern.permute.xlu0 %v583_v2  ;;  %s521_s24 = sshll.u32 %s710_s17, 5  ;;  %v271_v5 = vld [vmem:[%s702_s2 + $0x8] sm:$0xff]  ;;  %s520_s6 = sshll.u32 %s710_s17, 6 }
   0xe   : > { %287 = vperm.xlu1 %549, %v272_v0   ;;  %277 = vperm.xlu0 %548, %v270_v1   ;;  %s247_s27 = scalar_lea.vmem %s701_s1, %s521_s24  ;;  %s241_s9 = scalar_lea.vmem %s700_s0, %s520_s6 }
   0xf   : > { %550 = vset.pattern.permute.xlu2 %v583_v2  ;;  %v266_v3 = vld [vmem:[%s247_s27] sm:$0xff]  ;;  %v267_v6 = vld [vmem:[%s247_s27 + $0x8] sm:$0xff]  ;;  %v269_v7 = vld [vmem:[%s247_s27 + $0x18] sm:$0xff]  ;;  %s256_s13 = scalar_lea.vmem %s704_s4, %s520_s6 }
  0x10   : > { %364 = vperm.xlu2 %550, %v266_v3   ;;  %v268_v8 = vld [vmem:[%s247_s27 + $0x10] sm:$0xff]  ;;  %v654_v11 = vld [vmem:[%s241_s9] sm:$0xff]  ;;  %v656_v12 = vld [vmem:[%s241_s9 + $0x8] sm:$0xff] }
  0x11   : > { %v658_v13 = vld [vmem:[%s241_s9 + $0x10] sm:$0xff]  ;;  %v660_v14 = vld [vmem:[%s241_s9 + $0x18] sm:$0xff]  ;;  %v662_v15 = vld [vmem:[%s241_s9 + $0x20] sm:$0xff] }
  0x12   : > { %v664_v16 = vld [vmem:[%s241_s9 + $0x28] sm:$0xff]  ;;  %v670_v23 = vld [vmem:[%s241_s9 + $0x30] sm:$0xff]  ;;  %v672_v24 = vld [vmem:[%s241_s9 + $0x38] sm:$0xff] }
  0x16   : > { %292 = vperm.xlu1 %549, %v273_v4   ;;  %282 = vperm.xlu0 %548, %v271_v5  }
  0x18   : > { %369 = vperm.xlu2 %550, %v267_v6  }
  0x1e   : > { %379 = vperm.xlu1 %549, %v269_v7   ;;  %374 = vperm.xlu0 %548, %v268_v8  }
  0x6a   : > { %v365_v60 = vpop.permute.xlu2 %364 }
  0x80   : > { %v288_v9 = vpop.permute.xlu1 %287  ;;  %v278_v10 = vpop.permute.xlu0 %277 }
  0x81   : > { %v295_v18 = vmul.f32 %v278_v10, %v654_v11  ;;  %v296_v19 = vmul.f32 %v278_v10, %v656_v12  ;;  %v299_v25 = vmul.f32 %v288_v9, %v662_v15  ;;  %v300_v26 = vmul.f32 %v288_v9, %v664_v16 }
  0x88   : > { %v283_v17 = vpop.permute.xlu0 %282  ;;  %v293_v22 = vpop.permute.xlu1 %292 }
  0x89   : > { %v297_v20 = vmul.f32 %v283_v17, %v658_v13  ;;  %v298_v21 = vmul.f32 %v283_v17, %v660_v14  ;;  %v301_v29 = vmul.f32 %v293_v22, %v670_v23  ;;  %v302_v30 = vmul.f32 %v293_v22, %v672_v24 }
  0x8b   : > { %v303_v27 = vadd.f32 %v297_v20, %v295_v18  ;;  %v312_v28 = vadd.f32 %v298_v21, %v296_v19 }
  0x8d   : > { %v304_v31 = vadd.f32 %v303_v27, %v299_v25  ;;  %v313_v32 = vadd.f32 %v312_v28, %v300_v26 }
  0x8f   : > { %v305_v33 = vadd.f32 %v304_v31, %v301_v29  ;;  %v314_v34 = vadd.f32 %v313_v32, %v302_v30  ;;  %v370_v29 = vpop.permute.xlu2 %369 }
  0x90   : > { %v380_v10 = vpop.permute.xlu1 %379  ;;  %v375_v19 = vpop.permute.xlu0 %374 }
  0x91   : > { %v306_v35 = vrot.slane %v305_v33, 4  ;;  %v315_v36 = vrot.slane %v314_v34, 4 }
  0x93   : > { %v307_v37 = vadd.f32 %v306_v35, %v305_v33  ;;  %v316_v38 = vadd.f32 %v315_v36, %v314_v34 }
  0x95   : > { %v308_v39 = vrot.slane %v307_v37, 2  ;;  %v317_v40 = vrot.slane %v316_v38, 2 }
  0x97   : > { %v309_v41 = vadd.f32 %v308_v39, %v307_v37  ;;  %v318_v42 = vadd.f32 %v317_v40, %v316_v38 }
  0x99   : > { %v310_v43 = vrot.slane %v309_v41, 1  ;;  %v319_v44 = vrot.slane %v318_v42, 1 }
  0x9b   : > { %v311_v46 = vadd.f32 %v310_v43, %v309_v41  ;;  %v320_v47 = vadd.f32 %v319_v44, %v318_v42 }
  0x9d   : > { %v322_v48 = vadd.f32 %v321_v45, %v311_v46  ;;  %v323_v49 = vadd.f32 %v321_v45, %v320_v47 }
  0x9f   : > { %v516_v50 = vmul.f32 -1.442695, %v322_v48  ;;  %v517_v51 = vmul.f32 -1.442695, %v323_v49 }
  0xa1   : > { %551 = vpow2.f32 %v516_v50 }
  0xa2   : > { %553 = vpow2.f32 %v517_v51 }
  0xa7   : > { %v552_v52 = vpop.eup %551 }
  0xa8   : > { %v554_v53 = vpop.eup %553  ;;  %v330_v54 = vadd.f32 1.0, %v552_v52 }
  0xa9   : > { %v331_v55 = vadd.f32 1.0, %v554_v53 }
  0xaa   : > { %555 = vrcp.f32 %v330_v54  ;;  %v343_v62 = vand.u32 2147483648, %v330_v54  ;;  %v341_v1 = vand.u32 2147483647, %v330_v54  ;;  %vm337_vm2 = vweird.f32 %v330_v54 }
  0xab   : > { %557 = vrcp.f32 %v331_v55  ;;  %v358_v2 = vand.u32 2147483648, %v331_v55  ;;  %v356_v4 = vand.u32 2147483647, %v331_v55  ;;  %vm352_vm4 = vweird.f32 %v331_v55 }
  0xac   : > { %v344_v6 = vor.u32 1.1754944e-38, %v343_v62  ;;  %vm342_vm5 = vcmp.eq.f32.partialorder %v341_v1, 8.507059e+37 }
  0xad   : > { %v359_v9 = vor.u32 1.1754944e-38, %v358_v2  ;;  %vm357_vm7 = vcmp.eq.f32.partialorder %v356_v4, 8.507059e+37 }
  0xb0   : > { %v556_v56 = vpop.eup %555 }
  0xb1   : > { %v558_v57 = vpop.eup %557  ;;  %v333_v58 = vmul.f32 %v556_v56, %v330_v54  ;;  %vm338_vm0 = vweird.f32 %v556_v56 }
  0xb2   : > { %v348_v59 = vmul.f32 %v558_v57, %v331_v55  ;;  %vm353_vm1 = vweird.f32 %v558_v57  ;;  %vm339_vm3 = vmor %vm337_vm2, %vm338_vm0 }
  0xb3   : > { %v334_v61 = vsub.f32 1.0, %v333_v58  ;;  %vm354_vm6 = vmor %vm352_vm4, %vm353_vm1 }
  0xb4   : > { %v349_v63 = vsub.f32 1.0, %v348_v59 }
  0xb5   : > { %v335_v0 = vmul.f32 %v556_v56, %v334_v61 }
  0xb6   : > { %v350_v3 = vmul.f32 %v558_v57, %v349_v63 }
  0xb7   : > { %v336_v5 = vadd.f32 %v556_v56, %v335_v0 }
  0xb8   : > { %v351_v7 = vadd.f32 %v558_v57, %v350_v3 }
  0xb9   : > { %v340_v8 = vsel %vm339_vm3, %v556_v56, %v336_v5 }
  0xba   : > { %v345_v17 = vsel %vm342_vm5, %v344_v6, %v340_v8  ;;  %v355_v18 = vsel %vm354_vm6, %v558_v57, %v351_v7 }
  0xbb   : > { %v360_v20 = vsel %vm357_vm7, %v359_v9, %v355_v18  ;;  %v388_v21 = vadd.f32 %v380_v10, %v345_v17  ;;  %v386_v22 = vadd.f32 %v375_v19, %v345_v17  ;;  %v382_v25 = vadd.f32 %v365_v60, %v345_v17 }
  0xbc   : > { %v389_v26 = vadd.f32 %v380_v10, %v360_v20  ;;  %v387_v27 = vadd.f32 %v375_v19, %v360_v20  ;;  %v383_v28 = vadd.f32 %v365_v60, %v360_v20  ;;  %v384_v32 = vadd.f32 %v370_v29, %v345_v17 }
  0xbd   : > { %v396_v30 = vmul.f32 %v388_v21, %v670_v23  ;;  %v394_v31 = vmul.f32 %v386_v22, %v662_v15  ;;  %v385_v35 = vadd.f32 %v370_v29, %v360_v20  ;;  %v390_v36 = vmul.f32 %v382_v25, %v654_v11 }
  0xbe   : > { %v397_v33 = vmul.f32 %v389_v26, %v672_v24  ;;  %v395_v34 = vmul.f32 %v387_v27, %v664_v16  ;;  %v391_v37 = vmul.f32 %v383_v28, %v656_v12  ;;  %v392_v38 = vmul.f32 %v384_v32, %v658_v13 }
  0xbf   : > { %404 = vst [vmem:[%s256_s13 + $0x30] sm:$0xff] %v396_v30  ;;  %v393_v23 = vmul.f32 %v385_v35, %v660_v14 }
  0xc0   : > { %405 = vst [vmem:[%s256_s13 + $0x38] sm:$0xff] %v397_v33 }
  0xc1   : > { %402 = vst [vmem:[%s256_s13 + $0x20] sm:$0xff] %v394_v31 }
  0xc2   : > { %403 = vst [vmem:[%s256_s13 + $0x28] sm:$0xff] %v395_v34 }
  0xc3   : > { %398 = vst [vmem:[%s256_s13] sm:$0xff] %v390_v36 }
  0xc4   : > { %399 = vst [vmem:[%s256_s13 + $0x8] sm:$0xff] %v391_v37 }
  0xc5   : > { %400 = vst [vmem:[%s256_s13 + $0x10] sm:$0xff] %v392_v38 }
  0xc6   : > { %401 = vst [vmem:[%s256_s13 + $0x18] sm:$0xff] %v393_v23 }
  0xc7 PF: > { %s15_s19 = sadd.s32 1, %s581_s19   ;;  %s705_s17 = smov %s577_s18 }
  0xc8   : > { %p12_p5 = scmp.ge.s32.totalorder %s15_s19, 4   ;;  %s706_s18 = smov %s708_s3 }
  0xca   :  { %14 = sbr.rel (!%p12_p5) target bundleno = 2 (0x2), region = 69 }

</bundles_post_ra>
